<compile_context>
chip_gen: v6e
topology: v6e:2x2x1
jax: 0.10.0
libtpu: 0.0.40
codegen_flags: <defaults>
</compile_context>

<pallas_src>
import functools
import math

import jax
import jax.numpy as jnp
from jax.experimental import pallas as pl
from jax.experimental.pallas import tpu as pltpu

_DEFAULT_BLOCK_ELEMS = (1 * 1024 * 1024) // 4   # ~1 MiB of f32 per input block


def _tv_kernel(img_ref, out_ref, sxx_ref, syy_ref, carry_ref, *, img_h):
    """Process one (Bt, TH, W) tile (Bt images x TH rows).

    Grid: (batch_blocks, row_tiles). Per-image sums of squares of the horizontal
    (dx) and vertical (dy) differences are accumulated across the row-tile axis;
    sqrt + add happen only on the last row tile.
    """
    r = pl.program_id(1)
    nr = pl.num_programs(1)

    x = img_ref[...].astype(jnp.float32)            # (Bt, TH, W), f32 compute
    bt, th, w = x.shape

    local_row = jax.lax.broadcasted_iota(jnp.int32, (th, w), 0)   # row within tile
    col = jax.lax.broadcasted_iota(jnp.int32, (th, w), 1)         # column index
    global_row = local_row + r * th
    row_valid = global_row < img_h                  # masks padded rows of last tile

    @pl.when(r == 0)
    def _init():
        sxx_ref[...] = jnp.zeros_like(sxx_ref)
        syy_ref[...] = jnp.zeros_like(syy_ref)

    # Horizontal differences: aligned full-shape lane roll + wrap-column mask.
    if w > 1:
        x_right = pltpu.roll(x, shift=w - 1, axis=2)    # x_right[..., j] = x[..., (j+1) % w]
        dx = jnp.where(row_valid & (col < w - 1), x_right - x, 0.0)
        sxx_ref[...] += jnp.sum(jnp.sum(dx * dx, axis=2), axis=1, keepdims=True)

    # Vertical differences: sublane roll; the first row of each tile uses the carried
    # last row of the previous row tile (global row 0 is masked out).
    if img_h > 1:
        x_up = pltpu.roll(x, shift=1, axis=1)           # x_up[:, i, :] = x[:, (i-1) % th, :]
        prev = carry_ref[...]                           # (Bt, 1, W)
        x_prev = jnp.where(local_row == 0, prev, x_up)
        dy = jnp.where(row_valid & (global_row >= 1), x - x_prev, 0.0)
        syy_ref[...] += jnp.sum(jnp.sum(dy * dy, axis=2), axis=1, keepdims=True)
        carry_ref[...] = x[:, th - 1:th, :]             # carry last row to next tile

    @pl.when(r == nr - 1)
    def _finalize():
        out_ref[...] = jnp.sqrt(sxx_ref[...]) + jnp.sqrt(syy_ref[...])


def _choose_tiling(batch, height, width, max_block_elems):
    """Pick (Bt, TH): batch whole images when they are small, row-tile when large."""
    img_elems = height * width
    if img_elems <= max_block_elems:
        bt = max(1, min(batch, max_block_elems // img_elems))
        th = height
    else:
        bt = 1
        rows = max(1, max_block_elems // width)
        th = max(32, (rows // 32) * 32)     # multiple of 32: safe sublane tiling for any dtype
        th = min(th, height)
    return bt, th


def total_variation_loss(img: jax.Array, reduction: str = "mean", *,
                         max_block_elems: int | None = None) -> jax.Array:
    """Total variation of one or more 2D images along the last two dims."""
    if reduction not in ("mean", "sum"):
        raise ValueError(f"unknown reduction: {reduction}")
    if img.ndim < 2:
        raise ValueError("img must have at least 2 dimensions (..., H, W)")
    if max_block_elems is None:
        max_block_elems = _DEFAULT_BLOCK_ELEMS

    H, W = img.shape[-2], img.shape[-1]
    lead = img.shape[:-2]
    B = int(math.prod(lead)) if lead else 1

    x = img.reshape(B, H, W)
    # DMA in native dtype when it is a supported float type (halves HBM bytes for
    # bf16); everything else is promoted to f32 in the wrapper.
    if x.dtype not in (jnp.dtype(jnp.float32), jnp.dtype(jnp.bfloat16)):
        x = x.astype(jnp.float32)

    bt, th = _choose_tiling(B, H, W, max_block_elems)
    nb = pl.cdiv(B, bt)
    nr = pl.cdiv(H, th)

    tv = pl.pallas_call(
        functools.partial(_tv_kernel, img_h=H),
        out_shape=jax.ShapeDtypeStruct((nb * bt, 1), jnp.float32),
        grid=(nb, nr),
        in_specs=[pl.BlockSpec((bt, th, W), lambda b, r: (b, r, 0))],
        out_specs=pl.BlockSpec((bt, 1), lambda b, r: (b, 0)),
        scratch_shapes=[
            pltpu.VMEM((bt, 1), jnp.float32),      # sum(dx^2) per image
            pltpu.VMEM((bt, 1), jnp.float32),      # sum(dy^2) per image
            pltpu.VMEM((bt, 1, W), jnp.float32),   # last row of previous row tile (halo)
        ],
        compiler_params=pltpu.CompilerParams(
            dimension_semantics=("parallel", "arbitrary"),
            vmem_limit_bytes=32 * 1024 * 1024,
        ),
    )(x)

    tv = tv[:B, 0]                                 # drop padded batch tail
    tv = tv.reshape(lead) if lead else tv.reshape(())
    return jnp.mean(tv) if reduction == "mean" else jnp.sum(tv)


def _reference(img, reduction="mean"):
    x = img.astype(jnp.float32)
    dx = x[..., :, 1:] - x[..., :, :-1]
    dy = x[..., 1:, :] - x[..., :-1, :]
    tv = (jnp.sqrt(jnp.sum(dx * dx, axis=(-2, -1)))
          + jnp.sqrt(jnp.sum(dy * dy, axis=(-2, -1))))
    return jnp.mean(tv) if reduction == "mean" else jnp.sum(tv)


if __name__ == "__main__":
    key = jax.random.PRNGKey(0)
    k0, k1, k2, k3 = jax.random.split(key, 4)

    # (..., H, W) input, here (batch=2, channels=4, H=16, W=16): all 8 images are
    # batched into a single (8, 16, 16) block -> one grid step.
    img = jax.random.normal(k0, (2, 4, 16, 16), dtype=jnp.float32)
    out_mean = total_variation_loss(img, reduction="mean")
    out_sum = total_variation_loss(img, reduction="sum")
    jax.block_until_ready((out_mean, out_sum))
    assert jnp.allclose(out_mean, _reference(img, "mean"), rtol=1e-5, atol=1e-5)
    assert jnp.allclose(out_sum, _reference(img, "sum"), rtol=1e-5, atol=1e-5)

    # Row-tiled path: force 32-row tiles (3 tiles, last one padded) with halo carry.
    img_big = jax.random.normal(k1, (1, 70, 128), dtype=jnp.float32)
    out_big = total_variation_loss(img_big, reduction="sum", max_block_elems=32 * 128)
    assert jnp.allclose(out_big, _reference(img_big, "sum"), rtol=1e-5, atol=1e-5)

    # Partial last batch block: 5 images with Bt=2 -> padded tail is discarded.
    img_part = jax.random.normal(k2, (5, 16, 16), dtype=jnp.float32)
    out_part = total_variation_loss(img_part, reduction="mean", max_block_elems=2 * 16 * 16)
    assert jnp.allclose(out_part, _reference(img_part, "mean"), rtol=1e-5, atol=1e-5)

    # Native bf16 DMA path (cast to f32 inside the kernel).
    img_bf16 = jax.random.normal(k3, (2, 3, 16, 16), dtype=jnp.bfloat16)
    out_bf16 = total_variation_loss(img_bf16, reduction="mean")
    assert jnp.allclose(out_bf16, _reference(img_bf16, "mean"), rtol=1e-2, atol=1e-2)

    print("KERNEL_OK")
</pallas_src>

<mosaic_0001>
module attributes {stable_mosaic.version = 11 : i64} {
  func.func @_tv_kernel(%arg0: i32, %arg1: i32, %arg2: memref<8x16x16xf32, #tpu.memory_space<vmem>>, %arg3: memref<8x1xf32, #tpu.memory_space<vmem>>, %arg4: memref<8x1xf32, #tpu.memory_space<vmem>>, %arg5: memref<8x1xf32, #tpu.memory_space<vmem>>, %arg6: memref<8x1x16xf32, #tpu.memory_space<vmem>>) attributes {dimension_semantics = [#tpu.dimension_semantics<parallel>, #tpu.dimension_semantics<arbitrary>], iteration_bounds = array<i64: 1, 1>, scalar_prefetch = 0 : i64, scratch_operands = 3 : i64, tpu.core_type = #tpu.core_type<tc>, window_params = [{transform_indices = @transform_0, window_bounds = array<i64: 8, 16, 16>}, {transform_indices = @transform_1, window_bounds = array<i64: 8, 1>}]} {
    %c0 = arith.constant 0 : index
    %c0_0 = arith.constant 0 : index
    %c0_1 = arith.constant 0 : index
    %0 = vector.load %arg2[%c0, %c0_0, %c0_1] : memref<8x16x16xf32, #tpu.memory_space<vmem>>, vector<8x16x16xf32>
    %1 = tpu.iota {dimensions = array<i32: 0>} : vector<16x16xi32>
    %2 = tpu.iota {dimensions = array<i32: 1>} : vector<16x16xi32>
    %c16_i32 = arith.constant 16 : i32
    %3 = arith.muli %arg1, %c16_i32 : i32
    %4 = vector.broadcast %3 : i32 to vector<16x16xi32>
    %5 = arith.addi %1, %4 : vector<16x16xi32>
    %c16_i32_2 = arith.constant 16 : i32
    %6 = vector.broadcast %c16_i32_2 : i32 to vector<16x16xi32>
    %7 = arith.cmpi slt, %5, %6 : vector<16x16xi32>
    %c0_i32 = arith.constant 0 : i32
    %8 = arith.cmpi eq, %arg1, %c0_i32 : i32
    %9 = arith.extui %8 : i1 to i32
    %c0_i32_3 = arith.constant 0 : i32
    %10 = arith.cmpi ne, %9, %c0_i32_3 : i32
    scf.if %10 {
      %cst_28 = arith.constant 0.000000e+00 : f32
      %56 = vector.broadcast %cst_28 : f32 to vector<8x1xf32>
      %c0_29 = arith.constant 0 : index
      %c0_30 = arith.constant 0 : index
      %57 = vector.load %arg4[%c0_29, %c0_30] : memref<8x1xf32, #tpu.memory_space<vmem>>, vector<8x1xf32>
      tpu.vector_store %arg4[%c0_29, %c0_30], %56 {strides = array<i32>} : memref<8x1xf32, #tpu.memory_space<vmem>>, vector<8x1xf32>,
      %cst_31 = arith.constant 0.000000e+00 : f32
      %58 = vector.broadcast %cst_31 : f32 to vector<8x1xf32>
      %c0_32 = arith.constant 0 : index
      %c0_33 = arith.constant 0 : index
      %59 = vector.load %arg5[%c0_32, %c0_33] : memref<8x1xf32, #tpu.memory_space<vmem>>, vector<8x1xf32>
      tpu.vector_store %arg5[%c0_32, %c0_33], %58 {strides = array<i32>} : memref<8x1xf32, #tpu.memory_space<vmem>>, vector<8x1xf32>,
    } else {
    }
    %c15_i32 = arith.constant 15 : i32
    %11 = tpu.dynamic_rotate %0 by %c15_i32 dim 2 : vector<8x16x16xf32>, i32 -> vector<8x16x16xf32>
    %c15_i32_4 = arith.constant 15 : i32
    %12 = vector.broadcast %c15_i32_4 : i32 to vector<16x16xi32>
    %13 = arith.cmpi slt, %2, %12 : vector<16x16xi32>
    %14 = arith.andi %7, %13 : vector<16x16xi1>
    %15 = arith.subf %11, %0 : vector<8x16x16xf32>
    %cst = arith.constant 0.000000e+00 : f32
    %16 = vector.shape_cast %14 : vector<16x16xi1> to vector<1x16x16xi1>
    %17 = vector.broadcast %16 : vector<1x16x16xi1> to vector<8x16x16xi1>
    %18 = vector.broadcast %cst : f32 to vector<8x16x16xf32>
    %19 = arith.select %17, %15, %18 : vector<8x16x16xi1>, vector<8x16x16xf32>
    %c0_5 = arith.constant 0 : index
    %c0_6 = arith.constant 0 : index
    %20 = vector.load %arg4[%c0_5, %c0_6] : memref<8x1xf32, #tpu.memory_space<vmem>>, vector<8x1xf32>
    %21 = arith.mulf %19, %19 : vector<8x16x16xf32>
    %cst_7 = arith.constant dense<0.000000e+00> : vector<8x16xf32>
    %22 = vector.multi_reduction <add>, %21, %cst_7 [2] : vector<8x16x16xf32> to vector<8x16xf32>
    %cst_8 = arith.constant dense<0.000000e+00> : vector<8xf32>
    %23 = vector.multi_reduction <add>, %22, %cst_8 [1] : vector<8x16xf32> to vector<8xf32>
    %24 = vector.shape_cast %23 : vector<8xf32> to vector<8x1xf32>
    %25 = arith.addf %20, %24 : vector<8x1xf32>
    %c0_9 = arith.constant 0 : index
    %c0_10 = arith.constant 0 : index
    %26 = vector.load %arg4[%c0_9, %c0_10] : memref<8x1xf32, #tpu.memory_space<vmem>>, vector<8x1xf32>
    tpu.vector_store %arg4[%c0_9, %c0_10], %25 {strides = array<i32>} : memref<8x1xf32, #tpu.memory_space<vmem>>, vector<8x1xf32>,
    %c1_i32 = arith.constant 1 : i32
    %27 = tpu.dynamic_rotate %0 by %c1_i32 dim 1 : vector<8x16x16xf32>, i32 -> vector<8x16x16xf32>
    %c0_11 = arith.constant 0 : index
    %c0_12 = arith.constant 0 : index
    %c0_13 = arith.constant 0 : index
    %28 = vector.load %arg6[%c0_11, %c0_12, %c0_13] : memref<8x1x16xf32, #tpu.memory_space<vmem>>, vector<8x1x16xf32>
    %c0_i32_14 = arith.constant 0 : i32
    %29 = vector.broadcast %c0_i32_14 : i32 to vector<16x16xi32>
    %30 = arith.cmpi eq, %1, %29 : vector<16x16xi32>
    %31 = vector.shape_cast %30 : vector<16x16xi1> to vector<1x16x16xi1>
    %32 = vector.broadcast %31 : vector<1x16x16xi1> to vector<8x16x16xi1>
    %33 = vector.shape_cast %28 : vector<8x1x16xf32> to vector<8x1x16xf32>
    %34 = vector.broadcast %33 : vector<8x1x16xf32> to vector<8x16x16xf32>
    %35 = arith.select %32, %34, %27 : vector<8x16x16xi1>, vector<8x16x16xf32>
    %c1_i32_15 = arith.constant 1 : i32
    %36 = vector.broadcast %c1_i32_15 : i32 to vector<16x16xi32>
    %37 = arith.cmpi sge, %5, %36 : vector<16x16xi32>
    %38 = arith.andi %7, %37 : vector<16x16xi1>
    %39 = arith.subf %0, %35 : vector<8x16x16xf32>
    %cst_16 = arith.constant 0.000000e+00 : f32
    %40 = vector.shape_cast %38 : vector<16x16xi1> to vector<1x16x16xi1>
    %41 = vector.broadcast %40 : vector<1x16x16xi1> to vector<8x16x16xi1>
    %42 = vector.broadcast %cst_16 : f32 to vector<8x16x16xf32>
    %43 = arith.select %41, %39, %42 : vector<8x16x16xi1>, vector<8x16x16xf32>
    %c0_17 = arith.constant 0 : index
    %c0_18 = arith.constant 0 : index
    %44 = vector.load %arg5[%c0_17, %c0_18] : memref<8x1xf32, #tpu.memory_space<vmem>>, vector<8x1xf32>
    %45 = arith.mulf %43, %43 : vector<8x16x16xf32>
    %cst_19 = arith.constant dense<0.000000e+00> : vector<8x16xf32>
    %46 = vector.multi_reduction <add>, %45, %cst_19 [2] : vector<8x16x16xf32> to vector<8x16xf32>
    %cst_20 = arith.constant dense<0.000000e+00> : vector<8xf32>
    %47 = vector.multi_reduction <add>, %46, %cst_20 [1] : vector<8x16xf32> to vector<8xf32>
    %48 = vector.shape_cast %47 : vector<8xf32> to vector<8x1xf32>
    %49 = arith.addf %44, %48 : vector<8x1xf32>
    %c0_21 = arith.constant 0 : index
    %c0_22 = arith.constant 0 : index
    %50 = vector.load %arg5[%c0_21, %c0_22] : memref<8x1xf32, #tpu.memory_space<vmem>>, vector<8x1xf32>
    tpu.vector_store %arg5[%c0_21, %c0_22], %49 {strides = array<i32>} : memref<8x1xf32, #tpu.memory_space<vmem>>, vector<8x1xf32>,
    %51 = vector.extract_strided_slice %0 {offsets = [0, 15, 0], sizes = [8, 1, 16], strides = [1, 1, 1]} : vector<8x16x16xf32> to vector<8x1x16xf32>
    %c0_23 = arith.constant 0 : index
    %c0_24 = arith.constant 0 : index
    %c0_25 = arith.constant 0 : index
    %52 = vector.load %arg6[%c0_23, %c0_24, %c0_25] : memref<8x1x16xf32, #tpu.memory_space<vmem>>, vector<8x1x16xf32>
    tpu.vector_store %arg6[%c0_23, %c0_24, %c0_25], %51 {strides = array<i32>} : memref<8x1x16xf32, #tpu.memory_space<vmem>>, vector<8x1x16xf32>,
    %c0_i32_26 = arith.constant 0 : i32
    %53 = arith.cmpi eq, %arg1, %c0_i32_26 : i32
    %54 = arith.extui %53 : i1 to i32
    %c0_i32_27 = arith.constant 0 : i32
    %55 = arith.cmpi ne, %54, %c0_i32_27 : i32
    scf.if %55 {
      %c0_28 = arith.constant 0 : index
      %c0_29 = arith.constant 0 : index
      %56 = vector.load %arg4[%c0_28, %c0_29] : memref<8x1xf32, #tpu.memory_space<vmem>>, vector<8x1xf32>
      %57 = math.sqrt %56 : vector<8x1xf32>
      %c0_30 = arith.constant 0 : index
      %c0_31 = arith.constant 0 : index
      %58 = vector.load %arg5[%c0_30, %c0_31] : memref<8x1xf32, #tpu.memory_space<vmem>>, vector<8x1xf32>
      %59 = math.sqrt %58 : vector<8x1xf32>
      %60 = arith.addf %57, %59 : vector<8x1xf32>
      %c0_32 = arith.constant 0 : index
      %c0_33 = arith.constant 0 : index
      %61 = vector.load %arg3[%c0_32, %c0_33] : memref<8x1xf32, #tpu.memory_space<vmem>>, vector<8x1xf32>
      tpu.vector_store %arg3[%c0_32, %c0_33], %60 {strides = array<i32>} : memref<8x1xf32, #tpu.memory_space<vmem>>, vector<8x1xf32>,
    } else {
    }
    return
  }
  func.func @transform_0(%arg0: i32, %arg1: i32) -> (i32, i32, i32) {
    %c0_i32 = arith.constant 0 : i32
    %c0_i32_0 = arith.constant 0 : i32
    return %arg0, %arg1, %c0_i32 : i32, i32, i32
  }
  func.func @transform_1(%arg0: i32, %arg1: i32) -> (i32, i32) {
    %c0_i32 = arith.constant 0 : i32
    %c0_i32_0 = arith.constant 0 : i32
    return %arg0, %c0_i32 : i32, i32
  }
}

</mosaic_0001>

<bundles_post_ra>
// kernel: tpu_custom_call.1
= control target key start
LH: loop header
LB: loop body
LE: loop exit
PB: predicated region body
PF: predicated region fallthrough
CT: control target
= control target key end

     0   :  { %6 = vsyncpa [#allocation6], 0  ;;  %s890_s6 = smov [#allocation5]   ;;  %s1419_s0 = inlined_call_operand.hbm [shape: f32[8,16,16], index: 0, kind: input, shape index: {}]   ;;  %s1420_s1 = inlined_call_operand.vmem [shape: f32[8,1], index: 1, kind: output, shape index: {}]  }
   0x1   :  { %s12_s7 = sshll.u32 %s890_s6, 4  ;;  %s13_s7 = int_to_ptr.vmem [resolvable:$true] %s12_s7 }
   0x2   :  { %s876_s8 = scalar_lea.vmem %s13_s7, 2048  ;;  %p881_p1 = scmp.lt.s32.totalorder %s13_s7, %s13_s7 }
   0x3   :  { %p877_p0 = scmp.ne.s32.totalorder %s13_s7, %s876_s8  ;;  %p882_p2 = scmp.lt.s32.totalorder %s876_s8, %s876_s8 }
   0x5   :  { %p883_p3 = por %p882_p2, %p881_p1 }
   0x7   :  { %p884_p4 = pnand %p883_p3, %p877_p0 }
   0x9   :  { %887 = shalt.err (!%p884_p4)
}
   0xa   :  { %s891_s9 = smov 128   ;;  %s892_s10 = smov 8  }
   0xb   :  { %18 = dma.hbm_to_vmem [thread:$0]  %s1419_s0, 2048, %s13_s7, [#allocation6], %s891_s9, %s891_s9, %s892_s10  }
   0xc   :  { %888 = dma.done.wait [#allocation6], 2048  }
   0xd   :  { %889 = vsyncadd [#allocation6], 4294965248  ;;  %v910_v0 = vld [vmem:[#allocation5 + $0x10] sm:$0xff]  ;;  %v912_v1 = vld [vmem:[#allocation5] sm:$0xff]  ;;  %s893_s13 = smov 16   ;;  %vm814_vm0 = vcmask 130055   ;;  %v38_v18 = vlaneseq }
   0xe   :  { %63 = vrot.lane.b32.xlu1 %v910_v0, %s893_s13  ;;  %57 = vrot.lane.b32.xlu0 %v912_v1, %s893_s13  ;;  %v918_v2 = vld [vmem:[#allocation5 + $0x18] sm:$0xff]  ;;  %v920_v3 = vld [vmem:[#allocation5 + $0x8] sm:$0xff]  ;;  %v928_v6 = vld [vmem:[#allocation5 + $0x20] sm:$0xff]  ;;  %s894_s0 = smov 1   ;;  %v497_v20 = vrot.slane %v912_v1, 7  ;;  %vm337_vm4 = vcmask 130048  }
   0xf   :  { %v849_v4 = vld [vmem:[#allocation4] ss:$0 sm:$0xff]  ;;  %v926_v5 = vld [vmem:[#allocation5 + $0x28] sm:$0xff]  ;;  %v938_v8 = vld [vmem:[#allocation5 + $0x30] sm:$0xff]  ;;  %v997_v19 = vshrl.u32 %v38_v18, 7  ;;  %v505_v21 = vrot.slane %v920_v3, 7 }
  0x10   :  { %815 = vst.msk [vmem:[#allocation4 - $0x7] sm:$0x80] %vm814_vm0, %v920_v3  ;;  %v936_v7 = vld [vmem:[#allocation5 + $0x38] sm:$0xff]  ;;  %v944_v9 = vld [vmem:[#allocation5 + $0x48] sm:$0xff]  ;;  %v946_v10 = vld [vmem:[#allocation5 + $0x40] sm:$0xff]  ;;  %vm56_vm5 = vcmask 1047680  }
  0x11   :  { %v952_v11 = vld [vmem:[#allocation5 + $0x58] sm:$0xff]  ;;  %v954_v12 = vld [vmem:[#allocation5 + $0x50] sm:$0xff]  ;;  %v960_v13 = vld [vmem:[#allocation5 + $0x68] sm:$0xff]  ;;  %vm513_vm1 = vcmp.lt.s32.totalorder %v997_v19, 1  ;;  %vm538_vm2 = vcmp.eq.s32.totalorder %v997_v19, 0  ;;  %vm608_vm3 = vcmp.ge.s32.totalorder %v997_v19, 1 }
  0x12   :  { %66 = vrot.lane.b32.xlu1 %v918_v2, %s893_s13  ;;  %60 = vrot.lane.b32.xlu0 %v920_v3, %s893_s13  ;;  %v962_v14 = vld [vmem:[#allocation5 + $0x60] sm:$0xff]  ;;  %v968_v15 = vld [vmem:[#allocation5 + $0x78] sm:$0xff]  ;;  %v970_v16 = vld [vmem:[#allocation5 + $0x70] sm:$0xff]  ;;  %v522_v22 = vsel %vm513_vm1, %v505_v21, %v497_v20  ;;  %v514_v23 = vsel %vm513_vm1, %v497_v20, %v505_v21  ;;  %v498_v20 = vrot.slane %v910_v0, 7  ;;  %v506_v21 = vrot.slane %v918_v2, 7  ;;  %s895_s14 = smov 127  }
  0x13   :  { %v984_v17 = vld [vmem:[#allocation4 + $0x1] ss:$0 sm:$0xff]  ;;  %v592_v24 = vsel %vm538_vm2, %v849_v4, %v522_v22  ;;  %v613_v25 = vsub.f32 %v920_v3, %v514_v23  ;;  %v1055_v59 = vld [vmem:[#allocation4 + $0x2] ss:$0 sm:$0xff]  ;;  %vm411_vm6 = vcmask 130112   ;;  %vm476_vm7 = vcmask 1041409  }
  0x14   :  { %816 = vst.msk [vmem:[#allocation4 - $0x6] sm:$0x80] %vm814_vm0, %v918_v2  ;;  %v612_v26 = vsub.f32 %v912_v1, %v592_v24  ;;  %817 = vst.msk [vmem:[#allocation4 - $0x5] sm:$0x80] %vm814_vm0, %v926_v5  ;;  %v515_v22 = vsel %vm513_vm1, %v498_v20, %v506_v21  ;;  %v523_v23 = vsel %vm513_vm1, %v506_v21, %v498_v20  ;;  %vm53_vm9 = vcmask 7168  }
  0x15   :  { %v650_v27 = vmul.f32 %v613_v25, %v613_v25  ;;  %v615_v24 = vsub.f32 %v918_v2, %v515_v22  ;;  %v594_v25 = vsel %vm538_vm2, %v984_v17, %v523_v23  ;;  %vm478_vm10 = vcmask 1042434  }
  0x16   :  { %72 = vrot.lane.b32.xlu1 %v926_v5, %s893_s13  ;;  %69 = vrot.lane.b32.xlu0 %v928_v6, %s893_s13  ;;  %v632_v28 = vsel %vm608_vm3, %v612_v26, 0.0  ;;  %vm480_vm11 = vcmask 1043459   ;;  %vm482_vm12 = vcmask 1044484   ;;  %vm484_vm13 = vcmask 1045509  }
  0x17   :  { %v668_v29 = vsel %vm337_vm4, %v650_v27, 0.0  ;;  %v649_v30 = vmul.f32 %v632_v28, %v632_v28  ;;  %v652_v26 = vmul.f32 %v615_v24, %v615_v24  ;;  %v614_v27 = vsub.f32 %v910_v0, %v594_v25 }
  0x18   :  { %vm488_vm14 = vcmask 1047559   ;;  %vm486_vm15 = vcmask 1046534  }
  0x19   :  { %v665_v31 = vsel %vm337_vm4, %v649_v30, 0.0  ;;  %v674_v28 = vsel %vm337_vm4, %v652_v26, 0.0  ;;  %v634_v30 = vsel %vm608_vm3, %v614_v27, 0.0 }
  0x1a   :  { %78 = vrot.lane.b32.xlu1 %v936_v7, %s893_s13  ;;  %75 = vrot.lane.b32.xlu0 %v938_v8, %s893_s13 }
  0x1e   :  { %84 = vrot.lane.b32.xlu1 %v944_v9, %s893_s13  ;;  %81 = vrot.lane.b32.xlu0 %v946_v10, %s893_s13 }
  0x22   :  { %90 = vrot.lane.b32.xlu1 %v952_v11, %s893_s13  ;;  %87 = vrot.lane.b32.xlu0 %v954_v12, %s893_s13 }
  0x26   :  { %96 = vrot.lane.b32.xlu1 %v960_v13, %s893_s13  ;;  %93 = vrot.lane.b32.xlu0 %v962_v14, %s893_s13 }
  0x2a   :  { %102 = vrot.lane.b32.xlu1 %v968_v15, %s893_s13  ;;  %99 = vrot.lane.b32.xlu0 %v970_v16, %s893_s13 }
  0x2e   :  { %174 = vrot.lane.b32.xlu1 %v920_v3, %s894_s0  ;;  %172 = vrot.lane.b32.xlu0 %v912_v1, %s894_s0 }
  0x32   :  { %178 = vrot.lane.b32.xlu1 %v918_v2, %s894_s0  ;;  %176 = vrot.lane.b32.xlu0 %v910_v0, %s894_s0 }
  0x36   :  { %182 = vrot.lane.b32.xlu1 %v926_v5, %s894_s0  ;;  %180 = vrot.lane.b32.xlu0 %v928_v6, %s894_s0 }
  0x3a   :  { %186 = vrot.lane.b32.xlu1 %v936_v7, %s894_s0  ;;  %184 = vrot.lane.b32.xlu0 %v938_v8, %s894_s0 }
  0x3e   :  { %190 = vrot.lane.b32.xlu1 %v944_v9, %s894_s0  ;;  %188 = vrot.lane.b32.xlu0 %v946_v10, %s894_s0 }
  0x42   :  { %194 = vrot.lane.b32.xlu1 %v952_v11, %s894_s0  ;;  %192 = vrot.lane.b32.xlu0 %v954_v12, %s894_s0 }
  0x46   :  { %198 = vrot.lane.b32.xlu1 %v960_v13, %s894_s0  ;;  %196 = vrot.lane.b32.xlu0 %v962_v14, %s894_s0 }
  0x4a   :  { %202 = vrot.lane.b32.xlu1 %v968_v15, %s894_s0  ;;  %200 = vrot.lane.b32.xlu0 %v970_v16, %s894_s0 }
  0x69   :  { %669 = vadd.xlane.f32.xlu0 %v668_v29  ;;  %v1080_v29 = vld [vmem:[#allocation4 + $0x3] ss:$0 sm:$0xff] }
  0x6a   :  { %818 = vst.msk [vmem:[#allocation4 - $0x4] sm:$0x80] %vm814_vm0, %v936_v7 }
  0x6e   :  { %666 = vadd.xlane.f32.xlu1 %v665_v31  ;;  %v651_v31 = vmul.f32 %v634_v30, %v634_v30 }
  0x70   :  { %v671_v17 = vsel %vm337_vm4, %v651_v31, 0.0 }
  0x80   :  { %v64_v32 = vpop.permute.xlu1 %63  ;;  %v58_v33 = vpop.permute.xlu0 %57 }
  0x81   :  { %v59_v34 = vsel %vm56_vm5, %v58_v33, %v912_v1  ;;  %v65_v38 = vsel %vm56_vm5, %v64_v32, %v910_v0  ;;  %v1086_v32 = vld [vmem:[#allocation4 + $0x4] ss:$0 sm:$0xff]  ;;  %v1091_v33 = vld [vmem:[#allocation4 + $0x5] ss:$0 sm:$0xff] }
  0x82   :  { %105 = vrot.lane.b32.xlu0 %v59_v34, %s893_s13  ;;  %819 = vst.msk [vmem:[#allocation4 - $0x3] sm:$0x80] %vm814_vm0, %v944_v9  ;;  %820 = vst.msk [vmem:[#allocation4 - $0x2] sm:$0x80] %vm814_vm0, %v952_v11 }
  0x84   :  { %v67_v35 = vpop.permute.xlu1 %66  ;;  %v61_v36 = vpop.permute.xlu0 %60 }
  0x85   :  { %v62_v37 = vsel %vm56_vm5, %v61_v36, %v920_v3  ;;  %v68_v41 = vsel %vm56_vm5, %v67_v35, %v918_v2  ;;  %v1095_v35 = vld [vmem:[#allocation4 + $0x6] ss:$0 sm:$0xff] }
  0x86   :  { %107 = vrot.lane.b32.xlu1 %v62_v37, %s893_s13  ;;  %109 = vrot.lane.b32.xlu0 %v65_v38, %s893_s13  ;;  %821 = vst.msk [vmem:[#allocation4 - $0x1] sm:$0x80] %vm814_vm0, %v960_v13 }
  0x88   :  { %v73_v39 = vpop.permute.xlu1 %72  ;;  %v70_v40 = vpop.permute.xlu0 %69 }
  0x89   :  { %v71_v42 = vsel %vm56_vm5, %v70_v40, %v928_v6  ;;  %v74_v45 = vsel %vm56_vm5, %v73_v39, %v926_v5 }
  0x8a   :  { %111 = vrot.lane.b32.xlu1 %v68_v41, %s893_s13  ;;  %113 = vrot.lane.b32.xlu0 %v71_v42, %s893_s13 }
  0x8c   :  { %v79_v43 = vpop.permute.xlu1 %78  ;;  %v76_v44 = vpop.permute.xlu0 %75 }
  0x8d   :  { %v77_v46 = vsel %vm56_vm5, %v76_v44, %v938_v8  ;;  %v80_v49 = vsel %vm56_vm5, %v79_v43, %v936_v7 }
  0x8e   :  { %115 = vrot.lane.b32.xlu1 %v74_v45, %s893_s13  ;;  %117 = vrot.lane.b32.xlu0 %v77_v46, %s893_s13 }
  0x90   :  { %v85_v47 = vpop.permute.xlu1 %84  ;;  %v82_v48 = vpop.permute.xlu0 %81 }
  0x91   :  { %v83_v50 = vsel %vm56_vm5, %v82_v48, %v946_v10  ;;  %v86_v53 = vsel %vm56_vm5, %v85_v47, %v944_v9  ;;  %v1106_v48 = vand.u32 127, %v38_v18 }
  0x92   :  { %119 = vrot.lane.b32.xlu1 %v80_v49, %s893_s13  ;;  %121 = vrot.lane.b32.xlu0 %v83_v50, %s893_s13 }
  0x93   :  { %vm153_vm8 = vcmp.lt.s32.totalorder %v1106_v48, 15 }
  0x94   :  { %v91_v51 = vpop.permute.xlu1 %90  ;;  %v88_v52 = vpop.permute.xlu0 %87 }
  0x95   :  { %v89_v54 = vsel %vm56_vm5, %v88_v52, %v954_v12  ;;  %v92_v57 = vsel %vm56_vm5, %v91_v51, %v952_v11  ;;  %v406_v51 = vadd.s32 4294967288, %v1106_v48 }
  0x96   :  { %123 = vrot.lane.b32.xlu1 %v86_v53, %s893_s13  ;;  %125 = vrot.lane.b32.xlu0 %v89_v54, %s893_s13 }
  0x97   :  { %v1116_v54 = vsub.s32 %v406_v51, %v997_v19 }
  0x98   :  { %v97_v55 = vpop.permute.xlu1 %96  ;;  %v94_v56 = vpop.permute.xlu0 %93 }
  0x99   :  { %v95_v58 = vsel %vm56_vm5, %v94_v56, %v962_v14  ;;  %v98_v61 = vsel %vm56_vm5, %v97_v55, %v960_v13  ;;  %v1120_v55 = vsub.s32 %v1106_v48, %v997_v19 }
  0x9a   :  { %127 = vrot.lane.b32.xlu1 %v92_v57, %s893_s13  ;;  %129 = vrot.lane.b32.xlu0 %v95_v58, %s893_s13 }
  0x9c   :  { %v100_v60 = vpop.permute.xlu0 %99  ;;  %v103_v63 = vpop.permute.xlu1 %102 }
  0x9d   :  { %v101_v62 = vsel %vm56_vm5, %v100_v60, %v970_v16  ;;  %v104_v4 = vsel %vm56_vm5, %v103_v63, %v968_v15 }
  0x9e   :  { %131 = vrot.lane.b32.xlu1 %v98_v61, %s893_s13  ;;  %133 = vrot.lane.b32.xlu0 %v101_v62, %s893_s13 }
  0xa0   :  { %v173_v34 = vpop.permute.xlu0 %172  ;;  %v175_v36 = vpop.permute.xlu1 %174 }
  0xa2   :  { %135 = vrot.lane.b32.xlu1 %v104_v4, %s893_s13 }
  0xa4   :  { %v177_v37 = vpop.permute.xlu0 %176  ;;  %v179_v38 = vpop.permute.xlu1 %178 }
  0xa8   :  { %v181_v39 = vpop.permute.xlu0 %180  ;;  %v183_v40 = vpop.permute.xlu1 %182 }
  0xac   :  { %v185_v41 = vpop.permute.xlu0 %184  ;;  %v187_v42 = vpop.permute.xlu1 %186 }
  0xb0   :  { %v189_v43 = vpop.permute.xlu0 %188  ;;  %v1099_v44 = vpop.permute.xlu1 %190 }
  0xb4   :  { %v193_v45 = vpop.permute.xlu0 %192  ;;  %v1101_v46 = vpop.permute.xlu1 %194 }
  0xb8   :  { %v1103_v47 = vpop.permute.xlu0 %196  ;;  %v1108_v49 = vpop.permute.xlu1 %198 }
  0xbc   :  { %v1110_v50 = vpop.permute.xlu0 %200  ;;  %v1113_v53 = vpop.permute.xlu1 %202 }
  0xbd   :  { %675 = vadd.xlane.f32.xlu0 %v674_v28 }
  0xc6   :  { %672 = vadd.xlane.f32.xlu1 %v671_v17 }
  0xf2   :  { %v670_v52 = vpop.xlane.xlu0 %669 }
  0xf3   :  { %v736_v58 = vrot.slane %v670_v52, %v1116_v54 }
  0xf6   :  { %v106_v56 = vpop.permute.xlu0 %105 }
  0xf7   :  { %v137_v18 = vsel %vm56_vm5, %v106_v56, %v912_v1  ;;  %v667_v57 = vpop.xlane.xlu1 %666 }
  0xf8   :  { %v220_v60 = vsub.f32 %v137_v18, %v173_v34  ;;  %v732_v61 = vrot.slane %v667_v57, %v1120_v55 }
  0xfa   :  { %v1127_v62 = vsel %vm411_vm6, %v736_v58, %v732_v61  ;;  %256 = vrot.lane.b32.xlu0 %v220_v60, %s895_s14  ;;  %v110_v63 = vpop.permute.xlu0 %109  ;;  %v1160_v58 = vld [vmem:[#allocation4 + $0x7] ss:$0 sm:$0xff] }
  0xfb   :  { %v139_v4 = vsel %vm56_vm5, %v110_v63, %v910_v0  ;;  %v108_v20 = vpop.permute.xlu1 %107  ;;  %822 = vst.msk [vmem:[#allocation4] sm:$0x80] %vm814_vm0, %v968_v15 }
  0xfc   :  { %v222_v21 = vsub.f32 %v139_v4, %v177_v37  ;;  %v138_v1 = vsel %vm56_vm5, %v108_v20, %v920_v3 }
  0xfd   :  { %v221_v22 = vsub.f32 %v138_v1, %v175_v36 }
  0xfe   :  { %260 = vrot.lane.b32.xlu0 %v222_v21, %s895_s14  ;;  %v114_v23 = vpop.permute.xlu0 %113 }
  0xff   :  { %v141_v24 = vsel %vm56_vm5, %v114_v23, %v928_v6  ;;  %258 = vrot.lane.b32.xlu1 %v221_v22, %s895_s14  ;;  %v112_v25 = vpop.permute.xlu1 %111 }
 0x100   :  { %v224_v26 = vsub.f32 %v141_v24, %v181_v39  ;;  %v140_v27 = vsel %vm56_vm5, %v112_v25, %v918_v2  ;;  %v499_v24 = vrot.slane %v928_v6, 7 }
 0x101   :  { %v223_v0 = vsub.f32 %v140_v27, %v179_v38 }
 0x102   :  { %264 = vrot.lane.b32.xlu0 %v224_v26, %s895_s14  ;;  %v118_v28 = vpop.permute.xlu0 %117  ;;  %v508_v26 = vrot.slane %v936_v7, 7 }
 0x103   :  { %v143_v3 = vsel %vm56_vm5, %v118_v28, %v938_v8  ;;  %262 = vrot.lane.b32.xlu1 %v223_v0, %s895_s14  ;;  %v116_v30 = vpop.permute.xlu1 %115  ;;  %v501_v28 = vrot.slane %v946_v10, 7 }
 0x104   :  { %v226_v31 = vsub.f32 %v143_v3, %v185_v41  ;;  %v142_v17 = vsel %vm56_vm5, %v116_v30, %v926_v5  ;;  %v509_v3 = vrot.slane %v944_v9, 7 }
 0x105   :  { %v225_v34 = vsub.f32 %v142_v17, %v183_v40 }
 0x106   :  { %268 = vrot.lane.b32.xlu0 %v226_v31, %s895_s14  ;;  %v122_v36 = vpop.permute.xlu0 %121 }
 0x107   :  { %v145_v2 = vsel %vm56_vm5, %v122_v36, %v946_v10  ;;  %266 = vrot.lane.b32.xlu1 %v225_v34, %s895_s14  ;;  %v120_v37 = vpop.permute.xlu1 %119  ;;  %v518_v34 = vsel %vm513_vm1, %v501_v28, %v509_v3 }
 0x108   :  { %v228_v38 = vsub.f32 %v145_v2, %v189_v43  ;;  %v144_v39 = vsel %vm56_vm5, %v120_v37, %v936_v7  ;;  %v502_v2 = vrot.slane %v954_v12, 7  ;;  %v510_v37 = vrot.slane %v952_v11, 7 }
 0x109   :  { %v227_v51 = vsub.f32 %v144_v39, %v187_v42 }
 0x10a   :  { %272 = vrot.lane.b32.xlu0 %v228_v38, %s895_s14  ;;  %v126_v41 = vpop.permute.xlu0 %125 }
 0x10b   :  { %v147_v40 = vsel %vm56_vm5, %v126_v41, %v954_v12  ;;  %270 = vrot.lane.b32.xlu1 %v227_v51, %s895_s14  ;;  %v124_v52 = vpop.permute.xlu1 %123  ;;  %v526_v51 = vsel %vm513_vm1, %v509_v3, %v501_v28  ;;  %v519_v41 = vsel %vm513_vm1, %v502_v2, %v510_v37 }
 0x10c   :  { %v230_v56 = vsub.f32 %v147_v40, %v193_v45  ;;  %v146_v18 = vsel %vm56_vm5, %v124_v52, %v944_v9  ;;  %v503_v52 = vrot.slane %v962_v14, 7 }
 0x10d   :  { %v229_v57 = vsub.f32 %v146_v18, %v1099_v44 }
 0x10e   :  { %276 = vrot.lane.b32.xlu0 %v230_v56, %s895_s14  ;;  %v130_v43 = vpop.permute.xlu0 %129  ;;  %v511_v56 = vrot.slane %v960_v13, 7 }
 0x10f   :  { %v149_v42 = vsel %vm56_vm5, %v130_v43, %v962_v14  ;;  %274 = vrot.lane.b32.xlu1 %v229_v57, %s895_s14  ;;  %v128_v60 = vpop.permute.xlu1 %127  ;;  %v623_v57 = vsub.f32 %v952_v11, %v519_v41  ;;  %v527_v43 = vsel %vm513_vm1, %v510_v37, %v502_v2 }
 0x110   :  { %v232_v45 = vsub.f32 %v149_v42, %v1103_v47  ;;  %v148_v61 = vsel %vm56_vm5, %v128_v60, %v952_v11  ;;  %v520_v42 = vsel %vm513_vm1, %v503_v52, %v511_v56 }
 0x111   :  { %v231_v44 = vsub.f32 %v148_v61, %v1101_v46  ;;  %v660_v11 = vmul.f32 %v623_v57, %v623_v57 }
 0x112   :  { %280 = vrot.lane.b32.xlu0 %v232_v45, %s895_s14  ;;  %v134_v63 = vpop.permute.xlu0 %133 }
 0x113   :  { %v151_v4 = vsel %vm56_vm5, %v134_v63, %v970_v16  ;;  %278 = vrot.lane.b32.xlu1 %v231_v44, %s895_s14  ;;  %v132_v20 = vpop.permute.xlu1 %131  ;;  %v625_v44 = vsub.f32 %v960_v13, %v520_v42  ;;  %v528_v63 = vsel %vm513_vm1, %v511_v56, %v503_v52 }
 0x114   :  { %v234_v21 = vsub.f32 %v151_v4, %v1110_v50  ;;  %v150_v1 = vsel %vm56_vm5, %v132_v20, %v960_v13  ;;  %v507_v50 = vrot.slane %v926_v5, 7 }
 0x115   :  { %v233_v47 = vsub.f32 %v150_v1, %v1108_v49  ;;  %v500_v49 = vrot.slane %v938_v8, 7  ;;  %v698_v1 = vsel %vm337_vm4, %v660_v11, 0.0 }
 0x116   :  { %284 = vrot.lane.b32.xlu0 %v234_v21, %s895_s14  ;;  %v516_v25 = vsel %vm513_vm1, %v499_v24, %v507_v50  ;;  %v524_v0 = vsel %vm513_vm1, %v507_v50, %v499_v24 }
 0x117   :  { %282 = vrot.lane.b32.xlu1 %v233_v47, %s895_s14  ;;  %v136_v46 = vpop.permute.xlu1 %135  ;;  %v617_v27 = vsub.f32 %v926_v5, %v516_v25  ;;  %v596_v30 = vsel %vm538_vm2, %v1055_v59, %v524_v0  ;;  %v525_v5 = vsel %vm513_vm1, %v508_v26, %v500_v49  ;;  %v662_v47 = vmul.f32 %v625_v44, %v625_v44 }
 0x118   :  { %v152_v22 = vsel %vm56_vm5, %v136_v46, %v968_v15  ;;  %v616_v36 = vsub.f32 %v928_v6, %v596_v30  ;;  %v598_v59 = vsel %vm538_vm2, %v1080_v29, %v525_v5 }
 0x119   :  { %v235_v23 = vsub.f32 %v152_v22, %v1113_v53  ;;  %v517_v53 = vsel %vm513_vm1, %v500_v49, %v508_v26  ;;  %v654_v31 = vmul.f32 %v617_v27, %v617_v27  ;;  %v618_v40 = vsub.f32 %v938_v8, %v598_v59 }
 0x11a   :  { %v619_v17 = vsub.f32 %v936_v7, %v517_v53  ;;  %v621_v7 = vsub.f32 %v944_v9, %v518_v34  ;;  %v636_v6 = vsel %vm608_vm3, %v616_v36, 0.0  ;;  %v600_v9 = vsel %vm538_vm2, %v1086_v32, %v526_v51 }
 0x11b   :  { %286 = vrot.lane.b32.xlu1 %v235_v23, %s895_s14  ;;  %v680_v38 = vsel %vm337_vm4, %v654_v31, 0.0  ;;  %v653_v8 = vmul.f32 %v636_v6, %v636_v6  ;;  %v638_v60 = vsel %vm608_vm3, %v618_v40, 0.0  ;;  %v620_v45 = vsub.f32 %v946_v10, %v600_v9 }
 0x11c   :  { %v656_v39 = vmul.f32 %v619_v17, %v619_v17  ;;  %v658_v18 = vmul.f32 %v621_v7, %v621_v7  ;;  %v602_v32 = vsel %vm538_vm2, %v1091_v33, %v527_v43  ;;  %v655_v20 = vmul.f32 %v638_v60, %v638_v60 }
 0x11d   :  { %v677_v4 = vsel %vm337_vm4, %v653_v8, 0.0  ;;  %v640_v21 = vsel %vm608_vm3, %v620_v45, 0.0  ;;  %v622_v10 = vsub.f32 %v954_v12, %v602_v32  ;;  %v604_v33 = vsel %vm538_vm2, %v1095_v35, %v528_v63 }
 0x11e   :  { %v686_v29 = vsel %vm337_vm4, %v656_v39, 0.0  ;;  %v692_v61 = vsel %vm337_vm4, %v658_v18, 0.0  ;;  %v683_v13 = vsel %vm337_vm4, %v655_v20, 0.0  ;;  %v657_v46 = vmul.f32 %v640_v21, %v640_v21 }
 0x11f   :  { %v642_v22 = vsel %vm608_vm3, %v622_v10, 0.0  ;;  %v624_v23 = vsub.f32 %v962_v14, %v604_v33  ;;  %v704_v24 = vsel %vm337_vm4, %v662_v47, 0.0  ;;  %v504_v8 = vrot.slane %v970_v16, 7 }
 0x120   :  { %v689_v12 = vsel %vm337_vm4, %v657_v46, 0.0  ;;  %v659_v50 = vmul.f32 %v642_v22, %v642_v22  ;;  %v512_v60 = vrot.slane %v968_v15, 7 }
 0x121   :  { %v644_v35 = vsel %vm608_vm3, %v624_v23, 0.0 }
 0x122   :  { %v695_v25 = vsel %vm337_vm4, %v659_v50, 0.0  ;;  %v661_v49 = vmul.f32 %v644_v35, %v644_v35  ;;  %v529_v21 = vsel %vm513_vm1, %v512_v60, %v504_v8 }
 0x123   :  { %v606_v22 = vsel %vm538_vm2, %v1160_v58, %v529_v21 }
 0x124   :  { %v701_v27 = vsel %vm337_vm4, %v661_v49, 0.0 }
 0x135   :  { %681 = vadd.xlane.f32.xlu0 %v680_v38 }
 0x139   :  { %687 = vadd.xlane.f32.xlu0 %v686_v29 }
 0x13d   :  { %693 = vadd.xlane.f32.xlu0 %v692_v61 }
 0x13f   :  { %678 = vadd.xlane.f32.xlu1 %v677_v4 }
 0x141   :  { %699 = vadd.xlane.f32.xlu0 %v698_v1 }
 0x143   :  { %684 = vadd.xlane.f32.xlu1 %v683_v13 }
 0x145   :  { %705 = vadd.xlane.f32.xlu0 %v704_v24 }
 0x146   :  { %v676_v26 = vpop.xlane.xlu0 %675 }
 0x147   :  { %690 = vadd.xlane.f32.xlu1 %v689_v12  ;;  %v745_v14 = vrot.slane %v676_v26, %v1116_v54 }
 0x14b   :  { %696 = vadd.xlane.f32.xlu1 %v695_v25  ;;  %v626_v25 = vsub.f32 %v970_v16, %v606_v22 }
 0x14d   :  { %v646_v16 = vsel %vm608_vm3, %v626_v25, 0.0 }
 0x14f   :  { %702 = vadd.xlane.f32.xlu1 %v701_v27  ;;  %v673_v0 = vpop.xlane.xlu1 %672 }
 0x150   :  { %v741_v53 = vrot.slane %v673_v0, %v1120_v55 }
 0x152   :  { %v746_v28 = vsel %vm411_vm6, %v745_v14, %v741_v53 }
 0x153   :  { %v1265_v3 = vsel %vm476_vm7, %v746_v28, %v1127_v62 }
 0x16c   :  { %v257_v30 = vpop.permute.xlu0 %256 }
 0x16d   :  { %v304_v31 = vsel %vm153_vm8, %v257_v30, 0.0  ;;  %v521_v30 = vsel %vm513_vm1, %v504_v8, %v512_v60 }
 0x16e   :  { %v321_v17 = vmul.f32 %v304_v31, %v304_v31 }
 0x170   :  { %v261_v5 = vpop.permute.xlu0 %260  ;;  %v338_v34 = vsel %vm337_vm4, %v321_v17, 0.0 }
 0x171   :  { %v306_v36 = vsel %vm153_vm8, %v261_v5, 0.0  ;;  %v259_v2 = vpop.permute.xlu1 %258  ;;  %339 = vadd.xlane.f32.xlu0 %v338_v34 }
 0x172   :  { %v323_v37 = vmul.f32 %v306_v36, %v306_v36  ;;  %v305_v62 = vsel %vm153_vm8, %v259_v2, 0.0 }
 0x173   :  { %v322_v38 = vmul.f32 %v305_v62, %v305_v62  ;;  %v663_v62 = vmul.f32 %v646_v16, %v646_v16 }
 0x174   :  { %v265_v59 = vpop.permute.xlu0 %264  ;;  %v344_v39 = vsel %vm337_vm4, %v323_v37, 0.0  ;;  %v627_v37 = vsub.f32 %v968_v15, %v521_v30 }
 0x175   :  { %v308_v7 = vsel %vm153_vm8, %v265_v59, 0.0  ;;  %v263_v51 = vpop.permute.xlu1 %262  ;;  %345 = vadd.xlane.f32.xlu0 %v344_v39  ;;  %v341_v41 = vsel %vm337_vm4, %v322_v38, 0.0 }
 0x176   :  { %v325_v6 = vmul.f32 %v308_v7, %v308_v7  ;;  %v307_v40 = vsel %vm153_vm8, %v263_v51, 0.0  ;;  %342 = vadd.xlane.f32.xlu1 %v341_v41  ;;  %v664_v51 = vmul.f32 %v627_v37, %v627_v37  ;;  %v707_v41 = vsel %vm337_vm4, %v663_v62, 0.0 }
 0x177   :  { %v324_v52 = vmul.f32 %v307_v40, %v307_v40  ;;  %v896_v40 = vmov 0.0  }
 0x178   :  { %v269_v56 = vpop.permute.xlu0 %268  ;;  %v350_v29 = vsel %vm337_vm4, %v325_v6, 0.0  ;;  %v710_v15 = vsel %vm337_vm4, %v664_v51, 0.0  ;;  %54 = vst.msk [vmem:[#allocation2] sm:$0xff] %vm53_vm9, %v896_v40  ;;  %55 = vst.msk [vmem:[#allocation3] sm:$0xff] %vm53_vm9, %v896_v40 }
 0x179   :  { %v310_v9 = vsel %vm153_vm8, %v269_v56, 0.0  ;;  %v267_v18 = vpop.permute.xlu1 %266  ;;  %v347_v57 = vsel %vm337_vm4, %v324_v52, 0.0 }
 0x17a   :  { %v327_v43 = vmul.f32 %v310_v9, %v310_v9  ;;  %v309_v42 = vsel %vm153_vm8, %v267_v18, 0.0  ;;  %348 = vadd.xlane.f32.xlu0 %v347_v57  ;;  %351 = vadd.xlane.f32.xlu1 %v350_v29 }
 0x17b   :  { %v326_v45 = vmul.f32 %v309_v42, %v309_v42 }
 0x17c   :  { %v273_v61 = vpop.permute.xlu0 %272  ;;  %v356_v32 = vsel %vm337_vm4, %v327_v43, 0.0 }
 0x17d   :  { %v312_v11 = vsel %vm153_vm8, %v273_v61, 0.0  ;;  %v271_v44 = vpop.permute.xlu1 %270  ;;  %v353_v63 = vsel %vm337_vm4, %v326_v45, 0.0 }
 0x17e   :  { %v329_v4 = vmul.f32 %v312_v11, %v312_v11  ;;  %v311_v20 = vsel %vm153_vm8, %v271_v44, 0.0  ;;  %354 = vadd.xlane.f32.xlu0 %v353_v63  ;;  %357 = vadd.xlane.f32.xlu1 %v356_v32 }
 0x17f   :  { %v328_v10 = vmul.f32 %v311_v20, %v311_v20 }
 0x180   :  { %v277_v1 = vpop.permute.xlu0 %276  ;;  %v362_v33 = vsel %vm337_vm4, %v329_v4, 0.0 }
 0x181   :  { %v314_v47 = vsel %vm153_vm8, %v277_v1, 0.0  ;;  %v275_v13 = vpop.permute.xlu1 %274  ;;  %v359_v46 = vsel %vm337_vm4, %v328_v10, 0.0 }
 0x182   :  { %v331_v23 = vmul.f32 %v314_v47, %v314_v47  ;;  %v313_v24 = vsel %vm153_vm8, %v275_v13, 0.0  ;;  %360 = vadd.xlane.f32.xlu0 %v359_v46  ;;  %363 = vadd.xlane.f32.xlu1 %v362_v33 }
 0x183   :  { %v330_v12 = vmul.f32 %v313_v24, %v313_v24 }
 0x184   :  { %v281_v50 = vpop.permute.xlu0 %280  ;;  %v368_v35 = vsel %vm337_vm4, %v331_v23, 0.0 }
 0x185   :  { %v316_v49 = vsel %vm153_vm8, %v281_v50, 0.0  ;;  %v279_v26 = vpop.permute.xlu1 %278  ;;  %v365_v27 = vsel %vm337_vm4, %v330_v12, 0.0 }
 0x186   :  { %v333_v14 = vmul.f32 %v316_v49, %v316_v49  ;;  %v315_v58 = vsel %vm153_vm8, %v279_v26, 0.0  ;;  %366 = vadd.xlane.f32.xlu0 %v365_v27  ;;  %369 = vadd.xlane.f32.xlu1 %v368_v35 }
 0x187   :  { %v332_v0 = vmul.f32 %v315_v58, %v315_v58 }
 0x188   :  { %v285_v53 = vpop.permute.xlu0 %284  ;;  %v374_v28 = vsel %vm337_vm4, %v333_v14, 0.0 }
 0x189   :  { %v318_v31 = vsel %vm153_vm8, %v285_v53, 0.0  ;;  %v283_v17 = vpop.permute.xlu1 %282  ;;  %v371_v5 = vsel %vm337_vm4, %v332_v0, 0.0 }
 0x18a   :  { %v335_v34 = vmul.f32 %v318_v31, %v318_v31  ;;  %v317_v36 = vsel %vm153_vm8, %v283_v17, 0.0  ;;  %372 = vadd.xlane.f32.xlu0 %v371_v5  ;;  %375 = vadd.xlane.f32.xlu1 %v374_v28 }
 0x18b   :  { %v334_v2 = vmul.f32 %v317_v36, %v317_v36 }
 0x18c   :  { %v380_v38 = vsel %vm337_vm4, %v335_v34, 0.0 }
 0x18d   :  { %v287_v19 = vpop.permute.xlu1 %286  ;;  %v377_v59 = vsel %vm337_vm4, %v334_v2, 0.0 }
 0x18e   :  { %v319_v39 = vsel %vm153_vm8, %v287_v19, 0.0  ;;  %378 = vadd.xlane.f32.xlu0 %v377_v59  ;;  %381 = vadd.xlane.f32.xlu1 %v380_v38 }
 0x18f   :  { %v336_v7 = vmul.f32 %v319_v39, %v319_v39 }
 0x191   :  { %v383_v6 = vsel %vm337_vm4, %v336_v7, 0.0 }
 0x192   :  { %384 = vadd.xlane.f32.xlu0 %v383_v6  ;;  %708 = vadd.xlane.f32.xlu1 %v707_v41 }
 0x196   :  { %711 = vadd.xlane.f32.xlu0 %v710_v15 }
 0x1be   :  { %v682_v48 = vpop.xlane.xlu0 %681 }
 0x1bf   :  { %v754_v47 = vrot.slane %v682_v48, %v1116_v54 }
 0x1c2   :  { %v1333_v56 = vpop.xlane.xlu0 %687 }
 0x1c3   :  { %v763_v50 = vrot.slane %v1333_v56, %v1116_v54 }
 0x1c6   :  { %v1337_v9 = vpop.xlane.xlu0 %693 }
 0x1c7   :  { %v772_v35 = vrot.slane %v1337_v9, %v1116_v54 }
 0x1c8   :  { %v679_v52 = vpop.xlane.xlu1 %678 }
 0x1c9   :  { %v750_v33 = vrot.slane %v679_v52, %v1120_v55 }
 0x1ca   :  { %v1341_v57 = vpop.xlane.xlu0 %699 }
 0x1cb   :  { %v755_v0 = vsel %vm411_vm6, %v754_v47, %v750_v33  ;;  %v781_v59 = vrot.slane %v1341_v57, %v1116_v54  ;;  %v320_v33 = vld [vmem:[#allocation2] sm:$0xff] }
 0x1cc   :  { %v1335_v29 = vpop.xlane.xlu1 %684 }
 0x1cd   :  { %v759_v53 = vrot.slane %v1335_v29, %v1120_v55 }
 0x1ce   :  { %v1345_v42 = vpop.xlane.xlu0 %705 }
 0x1cf   :  { %v790_v41 = vrot.slane %v1345_v42, %v1116_v54  ;;  %v764_v52 = vsel %vm411_vm6, %v763_v50, %v759_v53 }
 0x1d0   :  { %v1339_v18 = vpop.xlane.xlu1 %690 }
 0x1d1   :  { %v768_v2 = vrot.slane %v1339_v18, %v1120_v55  ;;  %v802_v18 = vsel %vm478_vm10, %v755_v0, %v1265_v3 }
 0x1d3   :  { %v773_v57 = vsel %vm411_vm6, %v772_v35, %v768_v2 }
 0x1d4   :  { %v1343_v43 = vpop.xlane.xlu1 %696 }
 0x1d5   :  { %v777_v19 = vrot.slane %v1343_v43, %v1120_v55 }
 0x1d7   :  { %v782_v42 = vsel %vm411_vm6, %v781_v59, %v777_v19 }
 0x1d8   :  { %v1347_v60 = vpop.xlane.xlu1 %702 }
 0x1d9   :  { %v786_v51 = vrot.slane %v1347_v60, %v1120_v55 }
 0x1fa   :  { %v340_v8 = vpop.xlane.xlu0 %339 }
 0x1fb   :  { %v405_v26 = vrot.slane %v340_v8, %v1120_v55 }
 0x1fe   :  { %v346_v45 = vpop.xlane.xlu0 %345 }
 0x1ff   :  { %v343_v61 = vpop.xlane.xlu1 %342  ;;  %v416_v23 = vrot.slane %v346_v45, %v1120_v55 }
 0x200   :  { %v410_v24 = vrot.slane %v343_v61, %v1116_v54  ;;  %v803_v61 = vsel %vm480_vm11, %v764_v52, %v802_v18 }
 0x201   :  { %v804_v3 = vsel %vm482_vm12, %v773_v57, %v803_v61 }
 0x202   :  { %v412_v17 = vsel %vm411_vm6, %v410_v24, %v405_v26 }
 0x203   :  { %v352_v32 = vpop.xlane.xlu1 %351  ;;  %v349_v11 = vpop.xlane.xlu0 %348 }
 0x204   :  { %v420_v1 = vrot.slane %v349_v11, %v1116_v54  ;;  %v425_v25 = vrot.slane %v352_v32, %v1120_v55  ;;  %v791_v32 = vsel %vm411_vm6, %v790_v41, %v786_v51 }
 0x206   :  { %v421_v27 = vsel %vm411_vm6, %v420_v1, %v416_v23 }
 0x207   :  { %v358_v44 = vpop.xlane.xlu1 %357  ;;  %v355_v63 = vpop.xlane.xlu0 %354  ;;  %v477_v37 = vsel %vm476_vm7, %v421_v27, %v412_v17 }
 0x208   :  { %v429_v13 = vrot.slane %v355_v63, %v1116_v54  ;;  %v434_v14 = vrot.slane %v358_v44, %v1120_v55 }
 0x20a   :  { %v430_v28 = vsel %vm411_vm6, %v429_v13, %v425_v25 }
 0x20b   :  { %v364_v4 = vpop.xlane.xlu1 %363  ;;  %v361_v20 = vpop.xlane.xlu0 %360  ;;  %v479_v39 = vsel %vm478_vm10, %v430_v28, %v477_v37 }
 0x20c   :  { %v438_v12 = vrot.slane %v361_v20, %v1116_v54  ;;  %v443_v30 = vrot.slane %v364_v4, %v1120_v55  ;;  %v805_v20 = vsel %vm484_vm13, %v782_v42, %v804_v3 }
 0x20e   :  { %v439_v5 = vsel %vm411_vm6, %v438_v12, %v434_v14 }
 0x20f   :  { %v370_v21 = vpop.xlane.xlu1 %369  ;;  %v367_v10 = vpop.xlane.xlu0 %366  ;;  %v481_v6 = vsel %vm480_vm11, %v439_v5, %v479_v39 }
 0x210   :  { %v447_v49 = vrot.slane %v367_v10, %v1116_v54  ;;  %v452_v34 = vrot.slane %v370_v21, %v1120_v55  ;;  %v806_v21 = vsel %vm486_vm15, %v791_v32, %v805_v20 }
 0x212   :  { %v448_v62 = vsel %vm411_vm6, %v447_v49, %v443_v30 }
 0x213   :  { %v376_v46 = vpop.xlane.xlu1 %375  ;;  %v373_v22 = vpop.xlane.xlu0 %372  ;;  %v483_v56 = vsel %vm482_vm12, %v448_v62, %v481_v6 }
 0x214   :  { %v456_v58 = vrot.slane %v373_v22, %v1116_v54  ;;  %v461_v38 = vrot.slane %v376_v46, %v1120_v55  ;;  %v648_v46 = vld [vmem:[#allocation3] sm:$0xff] }
 0x216   :  { %v457_v7 = vsel %vm411_vm6, %v456_v58, %v452_v34 }
 0x217   :  { %v382_v16 = vpop.xlane.xlu1 %381  ;;  %v379_v31 = vpop.xlane.xlu0 %378  ;;  %v485_v43 = vsel %vm484_vm13, %v457_v7, %v483_v56 }
 0x218   :  { %v465_v36 = vrot.slane %v379_v31, %v1116_v54  ;;  %v470_v29 = vrot.slane %v382_v16, %v1120_v55 }
 0x21a   :  { %v466_v15 = vsel %vm411_vm6, %v465_v36, %v461_v38 }
 0x21b   :  { %v385_v40 = vpop.xlane.xlu0 %384  ;;  %v709_v48 = vpop.xlane.xlu1 %708  ;;  %v487_v45 = vsel %vm486_vm15, %v466_v15, %v485_v43 }
 0x21c   :  { %v474_v9 = vrot.slane %v385_v40, %v1116_v54  ;;  %v795_v8 = vrot.slane %v709_v48, %v1120_v55 }
 0x21e   :  { %v475_v60 = vsel %vm411_vm6, %v474_v9, %v470_v29 }
 0x21f   :  { %v712_v11 = vpop.xlane.xlu0 %711  ;;  %v489_v44 = vsel %vm488_vm14, %v475_v60, %v487_v45 }
 0x220   :  { %v799_v63 = vrot.slane %v712_v11, %v1116_v54  ;;  %v491_v4 = vsel %vm337_vm4, %v489_v44, 0.0 }
 0x221   :  { %492 = vadd.xlane.f32.xlu1 %v491_v4 }
 0x222   :  { %v800_v55 = vsel %vm411_vm6, %v799_v63, %v795_v8 }
 0x223   :  { %v807_v10 = vsel %vm488_vm14, %v800_v55, %v806_v21 }
 0x224   :  { %v809_v1 = vsel %vm337_vm4, %v807_v10, 0.0 }
 0x225   :  { %810 = vadd.xlane.f32.xlu0 %v809_v1 }
 0x2aa   :  { %v493_v47 = vpop.xlane.xlu1 %492 }
 0x2ab   :  { %v494_v13 = vadd.f32 %v493_v47, %v320_v33 }
 0x2ad   :  { %496 = vst.msk [vmem:[#allocation2] sm:$0xff] %vm53_vm9, %v494_v13 }
 0x2ae   :  { %v811_v54 = vpop.xlane.xlu0 %810 }
 0x2af   :  { %v812_v22 = vadd.f32 %v811_v54, %v648_v46 }
 0x2b1   :  { %813 = vst.msk [vmem:[#allocation3] sm:$0xff] %vm53_vm9, %v812_v22 }
 0x2b4   :  { %v826_v23 = vld [vmem:[#allocation2] sm:$0xff] }
 0x2b5   :  { %864 = vrsqrt.f32 %v826_v23  ;;  %vm829_vm0 = vcmp.eq.f32.partialorder %v826_v23, inf  ;;  %v832_v26 = vand.u32 2147483648, %v826_v23  ;;  %vm831_vm2 = vcmp.eq.f32.partialorder %v826_v23, 0.0 }
 0x2b8   :  { %v834_v24 = vld [vmem:[#allocation3] sm:$0xff] }
 0x2b9   :  { %866 = vrsqrt.f32 %v834_v24  ;;  %vm837_vm1 = vcmp.eq.f32.partialorder %v834_v24, inf  ;;  %v840_v27 = vand.u32 2147483648, %v834_v24  ;;  %vm839_vm3 = vcmp.eq.f32.partialorder %v834_v24, 0.0 }
 0x2c2   :  { %v865_v12 = vpop.eup %864 }
 0x2c3   :  { %v828_v50 = vmul.f32 %v865_v12, %v826_v23 }
 0x2c5   :  { %v830_v25 = vsel %vm829_vm0, %v826_v23, %v828_v50 }
 0x2c6   :  { %v867_v35 = vpop.eup %866  ;;  %v833_v58 = vsel %vm831_vm2, %v832_v26, %v830_v25 }
 0x2c7   :  { %v836_v49 = vmul.f32 %v867_v35, %v834_v24 }
 0x2c9   :  { %v838_v14 = vsel %vm837_vm1, %v834_v24, %v836_v49 }
 0x2ca   :  { %v841_v0 = vsel %vm839_vm3, %v840_v27, %v838_v14 }
 0x2cb   :  { %v842_v53 = vadd.f32 %v841_v0, %v833_v58 }
 0x2cd   :  { %843 = vst.msk [vmem:[%s1420_s1] sm:$0xff] %vm53_vm9, %v842_v53 }
 0x2ce   :  { %848 = vsyncpa [#allocation6], 1 }

</bundles_post_ra>
